<compile_context>
chip_gen: v7x
topology: tpu7x:2x2x1
jax: 0.10.0
libtpu: 0.0.40
codegen_flags: <defaults>
</compile_context>

<pallas_src>
import jax
import jax.numpy as jnp
from jax.experimental import pallas as pl
from jax.experimental.pallas import tpu as pltpu

NUM_UNITS = 32
NUM_LAYERS = 4


def highway_kernel(x_ref, w_ref, b_ref, o_ref):
    # x_ref / o_ref : (C, Tt)    channel-major activation tile (lanes = time)
    # w_ref         : (L, 2C, C) fused [linear; gate] weights (resident, f32)
    # b_ref         : (L, 2C, 1) fused [linear; gate] biases   (resident, f32)
    C = x_ref.shape[0]
    L = w_ref.shape[0]
    out = x_ref[...]
    for l in range(L):  # small static L -> fully unrolled (LLO visibility)
        # Explicit bf16 MXU operands (== what DEFAULT precision does to f32
        # anyway), f32 accumulation.  Weight cast is a tiny (2C, C) op.
        w_l = w_ref[l].astype(jnp.bfloat16)
        ht = jnp.dot(
            w_l, out.astype(jnp.bfloat16), preferred_element_type=jnp.float32
        ) + b_ref[l]
        h = jnp.maximum(ht[:C, :], 0.0)                 # relu half
        # sigmoid(x) = 0.5 + 0.5*tanh(x/2): one EUP push instead of exp+div.
        t = 0.5 + 0.5 * jnp.tanh(0.5 * ht[C:, :])       # gate half
        out = out + t * (h - out)                       # == h*t + out*(1-t)
    o_ref[...] = out


def _pick_time_tile(t_padded: int, batch: int, channels: int) -> int:
    """Largest lane-dense time tile that (a) divides the padded T, (b) keeps
    >= 2 total grid steps when possible (v7x: 2 TensorCores, both grid axes
    are 'parallel'), and (c) keeps the per-step VMEM estimate (double-buffered
    f32 I/O tiles + in-kernel temporaries) well under the 32 MiB scoped
    limit used on v6e/v7x."""
    vmem_budget = 24 * 1024 * 1024
    for cand in (16384, 8192, 4096, 2048, 1024, 512, 256, 128):
        if t_padded % cand:
            continue
        if cand > 128 and batch * (t_padded // cand) < 2:
            continue  # don't collapse the grid to one step (idles a v7x core)
        # ~2x2 double-buffered (C, tile) f32 I/O tiles + ~12 live temporaries.
        est_bytes = cand * channels * 4 * 16
        if est_bytes <= vmem_budget:
            return cand
    return 128


def highwaynet_pallas(x_bct, w_lin, b_lin, w_gate, b_gate):
    """x_bct: (B, C, T) f32. w_*: (L, C, C) with y = W @ x; b_*: (L, C, 1)."""
    B, C, T = x_bct.shape
    L = w_lin.shape[0]

    # Lane-dense padding: pad T to a multiple of 128 so stores are unmasked.
    # Highway layers act independently per timestep, so zero-padded columns
    # never affect real columns; the pad is sliced off afterwards.
    T_pad = ((T + 127) // 128) * 128
    x_in = x_bct if T_pad == T else jnp.pad(
        x_bct, ((0, 0), (0, 0), (0, T_pad - T)))

    tile_t = _pick_time_tile(T_pad, B, C)

    # Fuse linear + gate into one matmul per layer (f32 in HBM; cast to bf16
    # at the MXU inside the kernel).
    w_cat = jnp.concatenate([w_lin, w_gate], axis=1)   # (L, 2C, C)
    b_cat = jnp.concatenate([b_lin, b_gate], axis=1)   # (L, 2C, 1)

    out = pl.pallas_call(
        highway_kernel,
        out_shape=jax.ShapeDtypeStruct((B, C, T_pad), jnp.float32),
        grid_spec=pltpu.PrefetchScalarGridSpec(
            num_scalar_prefetch=0,
            grid=(B, T_pad // tile_t),
            in_specs=[
                # activations: one (C, tile_t) tile per (batch, time-tile) step
                pl.BlockSpec((None, C, tile_t), lambda b, t: (b, 0, t)),
                # fused weights / biases: whole stack resident, same block
                # index every step -> DMA'd exactly once
                pl.BlockSpec((L, 2 * C, C), lambda b, t: (0, 0, 0)),
                pl.BlockSpec((L, 2 * C, 1), lambda b, t: (0, 0, 0)),
            ],
            out_specs=pl.BlockSpec((None, C, tile_t), lambda b, t: (b, 0, t)),
        ),
        compiler_params=pltpu.CompilerParams(
            dimension_semantics=("parallel", "parallel"),
            vmem_limit_bytes=32 * 1024 * 1024,
        ),
    )(x_in, w_cat, b_cat)

    return out if T_pad == T else out[:, :, :T]


def highwaynet_ref(x_bct, w_lin, b_lin, w_gate, b_gate):
    # Structure-faithful reference (relu / sigmoid / h*t + out*(1-t)).  The
    # matmul operands are explicitly bf16 with f32 accumulation, pinning the
    # same MXU precision the kernel (and TPU DEFAULT precision) uses.
    out = x_bct
    for l in range(w_lin.shape[0]):
        ob = out.astype(jnp.bfloat16)
        h = jnp.maximum(
            jnp.einsum("oc,bct->bot", w_lin[l].astype(jnp.bfloat16), ob,
                       preferred_element_type=jnp.float32) + b_lin[l][None],
            0.0)
        t = jax.nn.sigmoid(
            jnp.einsum("oc,bct->bot", w_gate[l].astype(jnp.bfloat16), ob,
                       preferred_element_type=jnp.float32) + b_gate[l][None])
        out = h * t + out * (1.0 - t)
    return out


def _run_case(key, B, D, T):
    k_x, k_wl, k_bl, k_wg, k_bg = jax.random.split(key, 5)
    scale = 1.0 / jnp.sqrt(jnp.float32(D))
    x = jax.random.normal(k_x, (B, D, T), dtype=jnp.float32)
    w_lin = jax.random.normal(k_wl, (NUM_LAYERS, D, D), dtype=jnp.float32) * scale
    b_lin = jax.random.normal(k_bl, (NUM_LAYERS, D, 1), dtype=jnp.float32) * 0.01
    w_gate = jax.random.normal(k_wg, (NUM_LAYERS, D, D), dtype=jnp.float32) * scale
    b_gate = jax.random.normal(k_bg, (NUM_LAYERS, D, 1), dtype=jnp.float32) * 0.01

    out = highwaynet_pallas(x, w_lin, b_lin, w_gate, b_gate)
    jax.block_until_ready(out)

    ref = highwaynet_ref(x, w_lin, b_lin, w_gate, b_gate)
    assert out.shape == x.shape
    assert jnp.allclose(out, ref, atol=1e-4, rtol=1e-4), float(
        jnp.max(jnp.abs(out - ref))
    )


if __name__ == "__main__":
    key = jax.random.PRNGKey(0)
    k1, k2 = jax.random.split(key)
    # Tiny T (module-typical shape): exercises the padding / lane-dense path.
    _run_case(k1, B=2, D=NUM_UNITS, T=8)
    # T a multiple of 128: exercises the real tiled (unpadded) path.
    _run_case(k2, B=2, D=NUM_UNITS, T=256)
    print("KERNEL_OK")
</pallas_src>

<mosaic_0001>
module attributes {stable_mosaic.version = 11 : i64} {
  func.func @highway_kernel(%arg0: i32, %arg1: i32, %arg2: memref<1x32x128xf32, #tpu.memory_space<vmem>>, %arg3: memref<4x64x32xf32, #tpu.memory_space<vmem>>, %arg4: memref<4x64x1xf32, #tpu.memory_space<vmem>>, %arg5: memref<1x32x128xf32, #tpu.memory_space<vmem>>) attributes {dimension_semantics = [#tpu.dimension_semantics<parallel>, #tpu.dimension_semantics<parallel>], iteration_bounds = array<i64: 2, 1>, scalar_prefetch = 0 : i64, scratch_operands = 0 : i64, tpu.core_type = #tpu.core_type<tc>, window_params = [{transform_indices = @transform_0, window_bounds = array<i64: 1, 32, 128>}, {pipeline_mode = #tpu.pipeline_mode<synchronous>, transform_indices = @transform_1, window_bounds = array<i64: 4, 64, 32>}, {pipeline_mode = #tpu.pipeline_mode<synchronous>, transform_indices = @transform_2, window_bounds = array<i64: 4, 64, 1>}, {transform_indices = @transform_3, window_bounds = array<i64: 1, 32, 128>}]} {
    %c0 = arith.constant 0 : index
    %c0_0 = arith.constant 0 : index
    %c0_1 = arith.constant 0 : index
    %0 = vector.load %arg2[%c0, %c0_0, %c0_1] : memref<1x32x128xf32, #tpu.memory_space<vmem>>, vector<1x32x128xf32>
    %1 = vector.shape_cast %0 : vector<1x32x128xf32> to vector<32x128xf32>
    %c0_2 = arith.constant 0 : index
    %c0_3 = arith.constant 0 : index
    %c0_4 = arith.constant 0 : index
    %2 = vector.load %arg3[%c0_2, %c0_3, %c0_4] : memref<4x64x32xf32, #tpu.memory_space<vmem>>, vector<1x64x32xf32>
    %3 = vector.shape_cast %2 : vector<1x64x32xf32> to vector<64x32xf32>
    %4 = arith.truncf %3 : vector<64x32xf32> to vector<64x32xbf16>
    %5 = arith.truncf %1 : vector<32x128xf32> to vector<32x128xbf16>
    %cst = arith.constant dense<0.000000e+00> : vector<64x128xf32>
    %6 = tpu.matmul %4, %5, %cst {dimension_numbers = #tpu.dot_dimension_numbers<[1], [0], [0], [1], [0, 0, 1, 1], [], []>} : vector<64x32xbf16>, vector<32x128xbf16>, vector<64x128xf32> -> vector<64x128xf32>
    %c0_5 = arith.constant 0 : index
    %c0_6 = arith.constant 0 : index
    %c0_7 = arith.constant 0 : index
    %7 = vector.load %arg4[%c0_5, %c0_6, %c0_7] : memref<4x64x1xf32, #tpu.memory_space<vmem>>, vector<1x64x1xf32>
    %8 = vector.shape_cast %7 : vector<1x64x1xf32> to vector<64x1xf32>
    %9 = vector.broadcast %8 : vector<64x1xf32> to vector<64x128xf32>
    %10 = arith.addf %6, %9 : vector<64x128xf32>
    %11 = vector.extract_strided_slice %10 {offsets = [0, 0], sizes = [32, 128], strides = [1, 1]} : vector<64x128xf32> to vector<32x128xf32>
    %cst_8 = arith.constant 0.000000e+00 : f32
    %12 = vector.broadcast %cst_8 : f32 to vector<32x128xf32>
    %13 = arith.maximumf %11, %12 : vector<32x128xf32>
    %14 = vector.extract_strided_slice %10 {offsets = [32, 0], sizes = [32, 128], strides = [1, 1]} : vector<64x128xf32> to vector<32x128xf32>
    %cst_9 = arith.constant 5.000000e-01 : f32
    %15 = vector.broadcast %cst_9 : f32 to vector<32x128xf32>
    %16 = arith.mulf %15, %14 : vector<32x128xf32>
    %17 = math.tanh %16 : vector<32x128xf32>
    %cst_10 = arith.constant 5.000000e-01 : f32
    %18 = vector.broadcast %cst_10 : f32 to vector<32x128xf32>
    %19 = arith.mulf %18, %17 : vector<32x128xf32>
    %cst_11 = arith.constant 5.000000e-01 : f32
    %20 = vector.broadcast %cst_11 : f32 to vector<32x128xf32>
    %21 = arith.addf %20, %19 : vector<32x128xf32>
    %22 = arith.subf %13, %1 : vector<32x128xf32>
    %23 = arith.mulf %21, %22 : vector<32x128xf32>
    %24 = arith.addf %1, %23 : vector<32x128xf32>
    %c1 = arith.constant 1 : index
    %c0_12 = arith.constant 0 : index
    %c0_13 = arith.constant 0 : index
    %25 = vector.load %arg3[%c1, %c0_12, %c0_13] : memref<4x64x32xf32, #tpu.memory_space<vmem>>, vector<1x64x32xf32>
    %26 = vector.shape_cast %25 : vector<1x64x32xf32> to vector<64x32xf32>
    %27 = arith.truncf %26 : vector<64x32xf32> to vector<64x32xbf16>
    %28 = arith.truncf %24 : vector<32x128xf32> to vector<32x128xbf16>
    %cst_14 = arith.constant dense<0.000000e+00> : vector<64x128xf32>
    %29 = tpu.matmul %27, %28, %cst_14 {dimension_numbers = #tpu.dot_dimension_numbers<[1], [0], [0], [1], [0, 0, 1, 1], [], []>} : vector<64x32xbf16>, vector<32x128xbf16>, vector<64x128xf32> -> vector<64x128xf32>
    %c1_15 = arith.constant 1 : index
    %c0_16 = arith.constant 0 : index
    %c0_17 = arith.constant 0 : index
    %30 = vector.load %arg4[%c1_15, %c0_16, %c0_17] : memref<4x64x1xf32, #tpu.memory_space<vmem>>, vector<1x64x1xf32>
    %31 = vector.shape_cast %30 : vector<1x64x1xf32> to vector<64x1xf32>
    %32 = vector.broadcast %31 : vector<64x1xf32> to vector<64x128xf32>
    %33 = arith.addf %29, %32 : vector<64x128xf32>
    %34 = vector.extract_strided_slice %33 {offsets = [0, 0], sizes = [32, 128], strides = [1, 1]} : vector<64x128xf32> to vector<32x128xf32>
    %cst_18 = arith.constant 0.000000e+00 : f32
    %35 = vector.broadcast %cst_18 : f32 to vector<32x128xf32>
    %36 = arith.maximumf %34, %35 : vector<32x128xf32>
    %37 = vector.extract_strided_slice %33 {offsets = [32, 0], sizes = [32, 128], strides = [1, 1]} : vector<64x128xf32> to vector<32x128xf32>
    %cst_19 = arith.constant 5.000000e-01 : f32
    %38 = vector.broadcast %cst_19 : f32 to vector<32x128xf32>
    %39 = arith.mulf %38, %37 : vector<32x128xf32>
    %40 = math.tanh %39 : vector<32x128xf32>
    %cst_20 = arith.constant 5.000000e-01 : f32
    %41 = vector.broadcast %cst_20 : f32 to vector<32x128xf32>
    %42 = arith.mulf %41, %40 : vector<32x128xf32>
    %cst_21 = arith.constant 5.000000e-01 : f32
    %43 = vector.broadcast %cst_21 : f32 to vector<32x128xf32>
    %44 = arith.addf %43, %42 : vector<32x128xf32>
    %45 = arith.subf %36, %24 : vector<32x128xf32>
    %46 = arith.mulf %44, %45 : vector<32x128xf32>
    %47 = arith.addf %24, %46 : vector<32x128xf32>
    %c2 = arith.constant 2 : index
    %c0_22 = arith.constant 0 : index
    %c0_23 = arith.constant 0 : index
    %48 = vector.load %arg3[%c2, %c0_22, %c0_23] : memref<4x64x32xf32, #tpu.memory_space<vmem>>, vector<1x64x32xf32>
    %49 = vector.shape_cast %48 : vector<1x64x32xf32> to vector<64x32xf32>
    %50 = arith.truncf %49 : vector<64x32xf32> to vector<64x32xbf16>
    %51 = arith.truncf %47 : vector<32x128xf32> to vector<32x128xbf16>
    %cst_24 = arith.constant dense<0.000000e+00> : vector<64x128xf32>
    %52 = tpu.matmul %50, %51, %cst_24 {dimension_numbers = #tpu.dot_dimension_numbers<[1], [0], [0], [1], [0, 0, 1, 1], [], []>} : vector<64x32xbf16>, vector<32x128xbf16>, vector<64x128xf32> -> vector<64x128xf32>
    %c2_25 = arith.constant 2 : index
    %c0_26 = arith.constant 0 : index
    %c0_27 = arith.constant 0 : index
    %53 = vector.load %arg4[%c2_25, %c0_26, %c0_27] : memref<4x64x1xf32, #tpu.memory_space<vmem>>, vector<1x64x1xf32>
    %54 = vector.shape_cast %53 : vector<1x64x1xf32> to vector<64x1xf32>
    %55 = vector.broadcast %54 : vector<64x1xf32> to vector<64x128xf32>
    %56 = arith.addf %52, %55 : vector<64x128xf32>
    %57 = vector.extract_strided_slice %56 {offsets = [0, 0], sizes = [32, 128], strides = [1, 1]} : vector<64x128xf32> to vector<32x128xf32>
    %cst_28 = arith.constant 0.000000e+00 : f32
    %58 = vector.broadcast %cst_28 : f32 to vector<32x128xf32>
    %59 = arith.maximumf %57, %58 : vector<32x128xf32>
    %60 = vector.extract_strided_slice %56 {offsets = [32, 0], sizes = [32, 128], strides = [1, 1]} : vector<64x128xf32> to vector<32x128xf32>
    %cst_29 = arith.constant 5.000000e-01 : f32
    %61 = vector.broadcast %cst_29 : f32 to vector<32x128xf32>
    %62 = arith.mulf %61, %60 : vector<32x128xf32>
    %63 = math.tanh %62 : vector<32x128xf32>
    %cst_30 = arith.constant 5.000000e-01 : f32
    %64 = vector.broadcast %cst_30 : f32 to vector<32x128xf32>
    %65 = arith.mulf %64, %63 : vector<32x128xf32>
    %cst_31 = arith.constant 5.000000e-01 : f32
    %66 = vector.broadcast %cst_31 : f32 to vector<32x128xf32>
    %67 = arith.addf %66, %65 : vector<32x128xf32>
    %68 = arith.subf %59, %47 : vector<32x128xf32>
    %69 = arith.mulf %67, %68 : vector<32x128xf32>
    %70 = arith.addf %47, %69 : vector<32x128xf32>
    %c3 = arith.constant 3 : index
    %c0_32 = arith.constant 0 : index
    %c0_33 = arith.constant 0 : index
    %71 = vector.load %arg3[%c3, %c0_32, %c0_33] : memref<4x64x32xf32, #tpu.memory_space<vmem>>, vector<1x64x32xf32>
    %72 = vector.shape_cast %71 : vector<1x64x32xf32> to vector<64x32xf32>
    %73 = arith.truncf %72 : vector<64x32xf32> to vector<64x32xbf16>
    %74 = arith.truncf %70 : vector<32x128xf32> to vector<32x128xbf16>
    %cst_34 = arith.constant dense<0.000000e+00> : vector<64x128xf32>
    %75 = tpu.matmul %73, %74, %cst_34 {dimension_numbers = #tpu.dot_dimension_numbers<[1], [0], [0], [1], [0, 0, 1, 1], [], []>} : vector<64x32xbf16>, vector<32x128xbf16>, vector<64x128xf32> -> vector<64x128xf32>
    %c3_35 = arith.constant 3 : index
    %c0_36 = arith.constant 0 : index
    %c0_37 = arith.constant 0 : index
    %76 = vector.load %arg4[%c3_35, %c0_36, %c0_37] : memref<4x64x1xf32, #tpu.memory_space<vmem>>, vector<1x64x1xf32>
    %77 = vector.shape_cast %76 : vector<1x64x1xf32> to vector<64x1xf32>
    %78 = vector.broadcast %77 : vector<64x1xf32> to vector<64x128xf32>
    %79 = arith.addf %75, %78 : vector<64x128xf32>
    %80 = vector.extract_strided_slice %79 {offsets = [0, 0], sizes = [32, 128], strides = [1, 1]} : vector<64x128xf32> to vector<32x128xf32>
    %cst_38 = arith.constant 0.000000e+00 : f32
    %81 = vector.broadcast %cst_38 : f32 to vector<32x128xf32>
    %82 = arith.maximumf %80, %81 : vector<32x128xf32>
    %83 = vector.extract_strided_slice %79 {offsets = [32, 0], sizes = [32, 128], strides = [1, 1]} : vector<64x128xf32> to vector<32x128xf32>
    %cst_39 = arith.constant 5.000000e-01 : f32
    %84 = vector.broadcast %cst_39 : f32 to vector<32x128xf32>
    %85 = arith.mulf %84, %83 : vector<32x128xf32>
    %86 = math.tanh %85 : vector<32x128xf32>
    %cst_40 = arith.constant 5.000000e-01 : f32
    %87 = vector.broadcast %cst_40 : f32 to vector<32x128xf32>
    %88 = arith.mulf %87, %86 : vector<32x128xf32>
    %cst_41 = arith.constant 5.000000e-01 : f32
    %89 = vector.broadcast %cst_41 : f32 to vector<32x128xf32>
    %90 = arith.addf %89, %88 : vector<32x128xf32>
    %91 = arith.subf %82, %70 : vector<32x128xf32>
    %92 = arith.mulf %90, %91 : vector<32x128xf32>
    %93 = arith.addf %70, %92 : vector<32x128xf32>
    %c0_42 = arith.constant 0 : index
    %c0_43 = arith.constant 0 : index
    %c0_44 = arith.constant 0 : index
    %94 = vector.load %arg5[%c0_42, %c0_43, %c0_44] : memref<1x32x128xf32, #tpu.memory_space<vmem>>, vector<1x32x128xf32>
    %95 = vector.shape_cast %94 : vector<1x32x128xf32> to vector<32x128xf32>
    %96 = vector.shape_cast %93 : vector<32x128xf32> to vector<1x32x128xf32>
    tpu.vector_store %arg5[%c0_42, %c0_43, %c0_44], %96 {strides = array<i32>} : memref<1x32x128xf32, #tpu.memory_space<vmem>>, vector<1x32x128xf32>,
    return
  }
  func.func @transform_0(%arg0: i32, %arg1: i32) -> (i32, i32, i32) {
    %c0_i32 = arith.constant 0 : i32
    %c0_i32_0 = arith.constant 0 : i32
    return %arg0, %c0_i32, %arg1 : i32, i32, i32
  }
  func.func @transform_1(%arg0: i32, %arg1: i32) -> (i32, i32, i32) {
    %c0_i32 = arith.constant 0 : i32
    %c0_i32_0 = arith.constant 0 : i32
    %c0_i32_1 = arith.constant 0 : i32
    %c0_i32_2 = arith.constant 0 : i32
    return %c0_i32, %c0_i32_0, %c0_i32_1 : i32, i32, i32
  }
  func.func @transform_2(%arg0: i32, %arg1: i32) -> (i32, i32, i32) {
    %c0_i32 = arith.constant 0 : i32
    %c0_i32_0 = arith.constant 0 : i32
    %c0_i32_1 = arith.constant 0 : i32
    %c0_i32_2 = arith.constant 0 : i32
    return %c0_i32, %c0_i32_0, %c0_i32_1 : i32, i32, i32
  }
  func.func @transform_3(%arg0: i32, %arg1: i32) -> (i32, i32, i32) {
    %c0_i32 = arith.constant 0 : i32
    %c0_i32_0 = arith.constant 0 : i32
    return %arg0, %c0_i32, %arg1 : i32, i32, i32
  }
}

</mosaic_0001>

<bundles_post_ra>
// kernel: tpu_custom_call.1
= control target key start
LH: loop header
LB: loop body
LE: loop exit
PB: predicated region body
PF: predicated region fallthrough
CT: control target
= control target key end

     0   :  { %8 = vsyncpa [#allocation3], 0  ;;  %s1741_s0 = inlined_call_operand.vmem [shape: f32[2,32,128], index: 0, kind: input, shape index: {}]   ;;  %s1742_s1 = inlined_call_operand.vmem [shape: f32[4,64,32], index: 1, kind: input, shape index: {}]   ;;  %s1743_s2 = inlined_call_operand.vmem [shape: f32[4,64,1], index: 2, kind: input, shape index: {}]   ;;  %s1744_s3 = inlined_call_operand.hbm [shape: f32[2,32,128], index: 3, kind: output, shape index: {}]  }
   0x1   :  { %10 = vsyncpa [#allocation3 + $0x1], 0  ;;  %s1334_s12 = smov 0   ;;  %s1336_s13 = smov 0  }
   0x2   :  { %s1338_s14 = smov 0   ;;  %s1340_s15 = smov 0  }
   0x3   :  { %s1342_s16 = smov 0   ;;  %s1344_s17 = smov 0  }
   0x4 LB: > { %s987_s18 = sadd.s32 4294967295, %s1308_s17   ;;  %s988_s19 = sadd.s32 4294967294, %s1308_s17   ;;  %s1308_s17 = sphi %s1344_s17, %s16_s17   ;;  %s1304_s16 = sphi %s1342_s16, %s1751_s16   ;;  %s1300_s15 = sphi %s1340_s15, %s1750_s15   ;;  %s1296_s14 = sphi %s1338_s14, %s1749_s14   ;;  %s1292_s13 = sphi %s1336_s13, %s1748_s13   ;;  %s1288_s12 = sphi %s1334_s12, %s1747_s12  }
   0x5   : > { %s28_s20 = sadd.s32 1, %s1304_s16  ;;  %s107_s21 = sadd.s32 1, %s1296_s14 }
   0x6   : > { %p30_p0 = scmp.ge.s32.totalorder %s28_s20, 2  ;;  %p117_p1 = scmp.ne.s32.totalorder %s1296_s14, %s1292_s13 }
   0x7   : > { %p118_p2 = scmp.eq.s32.totalorder %s987_s18, 1  ;;  %p123_p3 = scmp.ne.s32.totalorder %s1292_s13, %s1288_s12 }
   0x8   : > { %s1753_s20 = smov (%p30_p0, %s28_s20), 0  ;;  %p124_p5 = scmp.eq.s32.totalorder %s988_s19, 1 }
   0x9   : > { %p1374_p4 = por %p118_p2, %p117_p1  ;;  %s102_s23 = ssub.s32 %s1304_s16, %s1753_s20 }
   0xa   : > { %p991_p6 = scmp.ge.s32.totalorder %s1308_s17, 1  ;;  %p105_p7 = scmp.eq.s32.totalorder %s102_s23, 0 }
   0xb   : > { %p1381_p8 = por %p124_p5, %p123_p3  ;;  %p159_p9 = scmp.lt.s32.totalorder %s1308_s17, 3 }
   0xc   : > { %s1387_s25 = scalar_select %p105_p7, %s1296_s14, %s107_s21  }
   0xd   : > { %p160_p10 = pnand %p991_p6, %p159_p9 }
   0xe   : > { %p186_p11 = scmp.lt.s32.totalorder (!%p160_p10), %s1300_s15, 1  ;;  %v199_v0 = vld [vmem:[%s1742_s1] sm:$0xff] (!%p160_p10)  ;;  %v200_v1 = vld [vmem:[%s1742_s1 + $0x8] sm:$0xff] (!%p160_p10)  ;;  %vm261_vm0 = vcmask (!%p160_p10), 261120   ;;  %v1310_v3 = vmov (!%p160_p10), 0   ;;  %v219_v5 = vld [vmem:[%s1743_s2 + $0x30] sm:$0xff] (!%p160_p10) }
   0xf   : > { %163 = sbr.rel (%p160_p10) target bundleno = 1066 (0x42a), region = 32  ;;  %v207_v2 = vpack.c.bf16 (!%p160_p10), %v200_v1, %v199_v0  ;;  %1196 = vset.pattern.permute.xlu0 (!%p160_p10), %v1310_v3  ;;  %1197 = vset.pattern.permute.xlu1 (!%p160_p10), %v1310_v3  ;;  %v217_v4 = vld [vmem:[%s1743_s2 + $0x20] sm:$0xff] (!%p160_p10)  ;;  %v218_v6 = vld [vmem:[%s1743_s2 + $0x28] sm:$0xff] (!%p160_p10)  ;;  %v220_v7 = vld [vmem:[%s1743_s2 + $0x38] sm:$0xff] (!%p160_p10)  ;;  %s1065_s23 = sshll.u32 (!%p160_p10), %s1300_s15, 9 }
  0x10   : > { %243 = vperm.xlu0 (!%p160_p10), %1196, %v217_v4   ;;  %253 = vperm.xlu1 (!%p160_p10), %1197, %v219_v5   ;;  %v213_v14 = vld [vmem:[%s1743_s2] sm:$0xff] (!%p160_p10)  ;;  %v214_v15 = vld [vmem:[%s1743_s2 + $0x8] sm:$0xff] (!%p160_p10)  ;;  %v201_v16 = vld [vmem:[%s1742_s1 + $0x10] sm:$0xff] (!%p160_p10)  ;;  %s1311_s5 = smov (!%p160_p10), [#allocation2]  }
  0x11   : > { %1094 = vmatprep.mubr.msk.bf16.mxu0 (!%p160_p10), %vm261_vm0, %v207_v2  ;;  %v202_v17 = vld [vmem:[%s1742_s1 + $0x18] sm:$0xff] (!%p160_p10)  ;;  %v203_v18 = vld [vmem:[%s1742_s1 + $0x20] sm:$0xff] (!%p160_p10)  ;;  %v204_v19 = vld [vmem:[%s1742_s1 + $0x28] sm:$0xff] (!%p160_p10)  ;;  %s1234_s6 = sshll.u32 (!%p160_p10), %s1311_s5, 4  ;;  %s1235_s6 = int_to_ptr.vmem [resolvable:$false] %s1234_s6 }
  0x12   : > { %v215_v20 = vld [vmem:[%s1743_s2 + $0x10] sm:$0xff] (!%p160_p10)  ;;  %v208_v21 = vpack.c.bf16 (!%p160_p10), %v202_v17, %v201_v16  ;;  %v216_v22 = vld [vmem:[%s1743_s2 + $0x18] sm:$0xff] (!%p160_p10)  ;;  %v209_v23 = vpack.c.bf16 (!%p160_p10), %v204_v19, %v203_v18  ;;  %v1011_v24 = vld [vmem:[%s1743_s2 + $0x60] sm:$0xff] (!%p160_p10)  ;;  %s1236_s7 = scalar_lea.vmem (!%p160_p10), %s1235_s6, 1024 }
  0x13   : > { %v1012_v25 = vld [vmem:[%s1743_s2 + $0x68] sm:$0xff] (!%p160_p10)  ;;  %v205_v26 = vld [vmem:[%s1742_s1 + $0x30] sm:$0xff] (!%p160_p10)  ;;  %v206_v27 = vld [vmem:[%s1742_s1 + $0x38] sm:$0xff] (!%p160_p10) }
  0x14   : > { %248 = vperm.xlu0 (!%p160_p10), %1196, %v218_v6   ;;  %258 = vperm.xlu1 (!%p160_p10), %1197, %v220_v7   ;;  %v1013_v28 = vld [vmem:[%s1743_s2 + $0x70] sm:$0xff] (!%p160_p10)  ;;  %v210_v29 = vpack.c.bf16 (!%p160_p10), %v206_v27, %v205_v26  ;;  %v1014_v30 = vld [vmem:[%s1743_s2 + $0x78] sm:$0xff] (!%p160_p10)  ;;  %v1007_v31 = vld [vmem:[%s1743_s2 + $0x40] sm:$0xff] (!%p160_p10) }
  0x15   : > { %v1008_v32 = vld [vmem:[%s1743_s2 + $0x48] sm:$0xff] (!%p160_p10)  ;;  %v1009_v33 = vld [vmem:[%s1743_s2 + $0x50] sm:$0xff] (!%p160_p10)  ;;  %v1010_v34 = vld [vmem:[%s1743_s2 + $0x58] sm:$0xff] (!%p160_p10) }
  0x16   : > { %s187_s30 = scalar_select %p186_p11, %s1300_s15, 1  ;;  %v1031_v35 = vld [vmem:[%s1743_s2 + $0xa0] sm:$0xff]  ;;  %v1032_v36 = vld [vmem:[%s1743_s2 + $0xa8] sm:$0xff]  ;;  %v1033_v37 = vld [vmem:[%s1743_s2 + $0xb0] sm:$0xff] }
  0x17   : > { %v1034_v38 = vld [vmem:[%s1743_s2 + $0xb8] sm:$0xff]  ;;  %v1027_v39 = vld [vmem:[%s1743_s2 + $0x80] sm:$0xff]  ;;  %v1028_v40 = vld [vmem:[%s1743_s2 + $0x88] sm:$0xff] }
  0x18   : > { %s1064_s8 = sshll.u32 %s187_s30, 5  ;;  %223 = vperm.xlu0 %1196, %v213_v14   ;;  %228 = vperm.xlu1 %1197, %v214_v15   ;;  %v1029_v41 = vld [vmem:[%s1743_s2 + $0x90] sm:$0xff]  ;;  %v1030_v42 = vld [vmem:[%s1743_s2 + $0x98] sm:$0xff]  ;;  %v1051_v43 = vld [vmem:[%s1743_s2 + $0xe0] sm:$0xff]  ;;  %s1688_s30 = scalar_lea.hbm %s1744_s3, %s1065_s23 }
  0x19   : > { %s193_s19 = scalar_lea.vmem %s1741_s0, %s1064_s8  ;;  %v1052_v44 = vld [vmem:[%s1743_s2 + $0xe8] sm:$0xff]  ;;  %v1053_v45 = vld [vmem:[%s1743_s2 + $0xf0] sm:$0xff]  ;;  %v1054_v46 = vld [vmem:[%s1743_s2 + $0xf8] sm:$0xff] }
  0x1a   : > { %v1413_v8 = vld [vmem:[%s193_s19] sm:$0xff]  ;;  %v1415_v9 = vld [vmem:[%s193_s19 + $0x8] sm:$0xff]  ;;  %v1417_v10 = vld [vmem:[%s193_s19 + $0x10] sm:$0xff] }
  0x1b   : > { %v211_v11 = vpack.c.bf16 %v1415_v9, %v1413_v8  ;;  %v1421_v12 = vld [vmem:[%s193_s19 + $0x18] sm:$0xff]  ;;  %v1047_v47 = vld [vmem:[%s1743_s2 + $0xc0] sm:$0xff]  ;;  %v1048_v48 = vld [vmem:[%s1743_s2 + $0xc8] sm:$0xff]  ;;  %s183_s19 = sand.u32 1, %s1292_s13  }
  0x1c   : > { %v212_v13 = vpack.c.bf16 %v1421_v12, %v1417_v10  ;;  %233 = vperm.xlu0 %1196, %v215_v20   ;;  %238 = vperm.xlu1 %1197, %v216_v22   ;;  %v1049_v49 = vld [vmem:[%s1743_s2 + $0xd0] sm:$0xff]  ;;  %v1050_v50 = vld [vmem:[%s1743_s2 + $0xd8] sm:$0xff]  ;;  %v999_v51 = vld [vmem:[%s1742_s1 + $0x40] sm:$0xff]  ;;  %s992_s21 = sshll.u32 %s183_s19, 5  ;;  %s1695_s15 = scalar_lea.sflag [#allocation3], %s183_s19 }
  0x1d   : > { %1090 = vmatprep.subr.bf16.mxu0 %v211_v11  ;;  %v1000_v52 = vld [vmem:[%s1742_s1 + $0x48] sm:$0xff]  ;;  %s185_s26 = scalar_lea.vmem [#allocation2], %s992_s21 }
  0x1e   : > { %1091 = vmatpush3.bf16.msra.mxu0 %v211_v11  ;;  %v380_v53 = vpack.c.bf16 %v1000_v52, %v999_v51  ;;  %s909_s27 = sshll.u32 %s185_s26, 4  ;;  %s1690_s27 = int_to_ptr.vmem [resolvable:$true] %s909_s27 }
  0x1f   : > { %1092 = vmatprep.subr.bf16.mxu0 %v212_v13  ;;  %s1230_s4 = scalar_lea.vmem %s1690_s27, 512  ;;  %p1237_p1 = scmp.lt.s32.totalorder %s1690_s27, %s1235_s6 }
  0x20   : > { %417 = vperm.xlu0 %1196, %v1011_v24   ;;  %422 = vperm.xlu1 %1197, %v1012_v25   ;;  %p1231_p12 = scmp.ne.s32.totalorder %s1690_s27, %s1230_s4  ;;  %p1238_p2 = scmp.lt.s32.totalorder %s1236_s7, %s1230_s4 }
  0x21   : > { %1106 = vmatprep.mubr.msk.bf16.mxu1 %vm261_vm0, %v380_v53 }
  0x22   : > { %1093 = vmatpush3.bf16.msra.mxu0 %v212_v13  ;;  %p1232_p13 = pnand %p1231_p12, %p1374_p4  ;;  %p1239_p3 = por %p1238_p2, %p1237_p1 }
  0x24   : > { %427 = vperm.xlu0 %1196, %v1013_v28   ;;  %432 = vperm.xlu1 %1197, %v1014_v30   ;;  %p1233_p0 = pneg %p1232_p13 }
  0x25   : > { %1095 = vmatmul.mubr.msk.bf16.vlgmr.msra.gmra.mrb[0].mxu0 %vm261_vm0, %v208_v21 }
  0x26   : > { %1098 = vmatprep.mubr.msk.bf16.mxu0 %vm261_vm0, %v209_v23  ;;  %p1240_p5 = pnand %p1239_p3, %p1233_p0 }
  0x28   : > { %397 = vperm.xlu0 %1196, %v1007_v31   ;;  %402 = vperm.xlu1 %1197, %v1008_v32  }
  0x2c   : > { %407 = vperm.xlu0 %1196, %v1009_v33   ;;  %412 = vperm.xlu1 %1197, %v1010_v34  }
  0x2d   : > { %1099 = vmatmul.mubr.msk.bf16.gmra.mrb[4].mxu0 %vm261_vm0, %v210_v29 }
  0x30   : > { %590 = vperm.xlu0 %1196, %v1031_v35   ;;  %595 = vperm.xlu1 %1197, %v1032_v36  }
  0x34   : > { %600 = vperm.xlu0 %1196, %v1033_v37   ;;  %605 = vperm.xlu1 %1197, %v1034_v38  }
  0x38   : > { %570 = vperm.xlu0 %1196, %v1027_v39   ;;  %575 = vperm.xlu1 %1197, %v1028_v40  }
  0x3c   : > { %580 = vperm.xlu0 %1196, %v1029_v41   ;;  %585 = vperm.xlu1 %1197, %v1030_v42  }
  0x40   : > { %763 = vperm.xlu0 %1196, %v1051_v43   ;;  %768 = vperm.xlu1 %1197, %v1052_v44  }
  0x44   : > { %773 = vperm.xlu0 %1196, %v1053_v45   ;;  %778 = vperm.xlu1 %1197, %v1054_v46  }
  0x48   : > { %743 = vperm.xlu0 %1196, %v1047_v47   ;;  %748 = vperm.xlu1 %1197, %v1048_v48  }
  0x4c   : > { %753 = vperm.xlu0 %1196, %v1049_v49   ;;  %758 = vperm.xlu1 %1197, %v1050_v50  }
  0x8f   : > { %v244_v54 = vpop.permute.xlu0 %243  ;;  %v254_v56 = vpop.permute.xlu1 %253 }
  0x93   : > { %v249_v60 = vpop.permute.xlu0 %248  ;;  %v259_v61 = vpop.permute.xlu1 %258 }
  0x97   : > { %v224_v3 = vpop.permute.xlu0 %223  ;;  %v229_v13 = vpop.permute.xlu1 %228 }
  0x9b   : > { %v234_v16 = vpop.permute.xlu0 %233  ;;  %v239_v18 = vpop.permute.xlu1 %238 }
  0xf8   : > { %v1096_v55 = vpop.f32.mrb[0].mxu0 }
  0xf9   : > { %v308_v57 = vpop.f32.mrb[1].mxu0  ;;  %v317_v17 = vadd.f32 %v1096_v55, %v234_v16  ;;  %v1006_v55 = vld [vmem:[%s1742_s1 + $0x78] sm:$0xff] }
  0xfa   : > { %v1097_v58 = vpop.f32.mrb[2].mxu0  ;;  %v309_v19 = vadd.f32 %v308_v57, %v224_v3  ;;  %v1019_v57 = vld [vmem:[%s1742_s1 + $0x80] sm:$0xff] }
  0xfb   : > { %v311_v59 = vpop.f32.mrb[3].mxu0  ;;  %v320_v20 = vadd.f32 %v1097_v58, %v239_v18  ;;  %v341_v22 = vmax.f32 %v317_v17, 0.0  ;;  %v1020_v58 = vld [vmem:[%s1742_s1 + $0x88] sm:$0xff] }
  0xfc   : > { %v312_v21 = vadd.f32 %v311_v59, %v229_v13  ;;  %v339_v24 = vmax.f32 %v309_v19, 0.0  ;;  %v553_v59 = vpack.c.bf16 %v1020_v58, %v1019_v57 }
  0xfd   : > { %v342_v26 = vmax.f32 %v320_v20, 0.0  ;;  %v361_v32 = vsub.f32 %v341_v22, %v1417_v10 }
  0xfe   : > { %v340_v29 = vmax.f32 %v312_v21, 0.0  ;;  %v359_v35 = vsub.f32 %v339_v24, %v1413_v8  ;;  %1118 = vmatprep.mubr.msk.bf16.mxu0 %vm261_vm0, %v553_v59 }
  0xff   : > { %v362_v38 = vsub.f32 %v342_v26, %v1421_v12 }
 0x100   : > { %v1100_v62 = vpop.f32.mrb[4].mxu0  ;;  %v360_v41 = vsub.f32 %v340_v29, %v1415_v9 }
 0x101   : > { %v333_v63 = vadd.f32 %v1100_v62, %v254_v56  ;;  %v324_v0 = vpop.f32.mrb[5].mxu0  ;;  %v423_v62 = vpop.permute.xlu1 %422 }
 0x102   : > { %v325_v1 = vadd.f32 %v324_v0, %v244_v54  ;;  %v1101_v2 = vpop.f32.mrb[6].mxu0  ;;  %v1005_v54 = vld [vmem:[%s1742_s1 + $0x70] sm:$0xff] }
 0x103   : > { %v345_v4 = vmul.f32 0.5, %v333_v63  ;;  %v336_v5 = vadd.f32 %v1101_v2, %v259_v61  ;;  %v327_v6 = vpop.f32.mrb[7].mxu0  ;;  %v383_v56 = vpack.c.bf16 %v1006_v55, %v1005_v54 }
 0x104   : > { %v343_v7 = vmul.f32 0.5, %v325_v1  ;;  %v328_v11 = vadd.f32 %v327_v6, %v249_v60  ;;  %v418_v60 = vpop.permute.xlu0 %417 }
 0x105   : > { %1198 = vtanh.f32 %v345_v4  ;;  %v346_v14 = vmul.f32 0.5, %v336_v5  ;;  %v433_v3 = vpop.permute.xlu1 %432 }
 0x106   : > { %1200 = vtanh.f32 %v343_v7  ;;  %v344_v15 = vmul.f32 0.5, %v328_v11 }
 0x107   : > { %1202 = vtanh.f32 %v346_v14 }
 0x108   : > { %1204 = vtanh.f32 %v344_v15  ;;  %v428_v2 = vpop.permute.xlu0 %427 }
 0x109   : > { %v403_v19 = vpop.permute.xlu1 %402 }
 0x10c   : > { %v398_v13 = vpop.permute.xlu0 %397 }
 0x10d   : > { %v413_v24 = vpop.permute.xlu1 %412 }
 0x10f   : > { %v1199_v23 = vpop.eup %1198 }
 0x110   : > { %v1201_v25 = vpop.eup %1200  ;;  %v353_v27 = vmul.f32 0.5, %v1199_v23  ;;  %v408_v22 = vpop.permute.xlu0 %407 }
 0x111   : > { %v1203_v28 = vpop.eup %1202  ;;  %v351_v30 = vmul.f32 0.5, %v1201_v25 }
 0x112   : > { %v1205_v31 = vpop.eup %1204  ;;  %v357_v33 = vadd.f32 0.5, %v353_v27  ;;  %v354_v34 = vmul.f32 0.5, %v1203_v28 }
 0x113   : > { %v355_v36 = vadd.f32 0.5, %v351_v30  ;;  %v352_v37 = vmul.f32 0.5, %v1205_v31 }
 0x114   : > { %v365_v39 = vmul.f32 %v361_v32, %v357_v33  ;;  %v358_v40 = vadd.f32 0.5, %v354_v34 }
 0x115   : > { %v363_v42 = vmul.f32 %v359_v35, %v355_v36  ;;  %v356_v43 = vadd.f32 0.5, %v352_v37 }
 0x116   : > { %v366_v44 = vmul.f32 %v362_v38, %v358_v40  ;;  %v1553_v50 = vadd.f32 %v365_v39, %v1417_v10  ;;  %v1004_v10 = vld [vmem:[%s1742_s1 + $0x68] sm:$0xff] }
 0x117   : > { %v364_v45 = vmul.f32 %v360_v41, %v356_v43  ;;  %v1542_v46 = vadd.f32 %v363_v42, %v1413_v8  ;;  %v1001_v8 = vld [vmem:[%s1742_s1 + $0x50] sm:$0xff] }
 0x118   : > { %v1548_v48 = vadd.f32 %v366_v44, %v1421_v12  ;;  %v1003_v12 = vld [vmem:[%s1742_s1 + $0x60] sm:$0xff] }
 0x119   : > { %v1545_v47 = vadd.f32 %v364_v45, %v1415_v9  ;;  %v1002_v9 = vld [vmem:[%s1742_s1 + $0x58] sm:$0xff]  ;;  %v382_v53 = vpack.c.bf16 %v1004_v10, %v1003_v12 }
 0x11a   : > { %v385_v51 = vpack.c.bf16 %v1548_v48, %v1553_v50  ;;  %v381_v52 = vpack.c.bf16 %v1002_v9, %v1001_v8 }
 0x11b   : > { %v384_v49 = vpack.c.bf16 %v1545_v47, %v1542_v46 }
 0x11d   : > { %1102 = vmatprep.subr.bf16.mxu1 %v384_v49 }
 0x11e   : > { %1103 = vmatpush3.bf16.msra.mxu1 %v384_v49 }
 0x11f   : > { %1104 = vmatprep.subr.bf16.mxu1 %v385_v51 }
 0x122   : > { %1105 = vmatpush3.bf16.msra.mxu1 %v385_v51 }
 0x125   : > { %1107 = vmatmul.mubr.msk.bf16.vlgmr.msra.gmra.mrb[0].mxu1 %vm261_vm0, %v381_v52 }
 0x126   : > { %1110 = vmatprep.mubr.msk.bf16.mxu1 %vm261_vm0, %v382_v53 }
 0x12d   : > { %1111 = vmatmul.mubr.msk.bf16.gmra.mrb[4].mxu1 %vm261_vm0, %v383_v56 }
 0x1f8   : > { %v1108_v61 = vpop.f32.mrb[0].mxu1 }
 0x1f9   : > { %v481_v63 = vpop.f32.mrb[1].mxu1  ;;  %v490_v23 = vadd.f32 %v1108_v61, %v408_v22  ;;  %v1026_v61 = vld [vmem:[%s1742_s1 + $0xb8] sm:$0xff] }
 0x1fa   : > { %v1109_v0 = vpop.f32.mrb[2].mxu1  ;;  %v482_v25 = vadd.f32 %v481_v63, %v398_v13  ;;  %v1039_v63 = vld [vmem:[%s1742_s1 + $0xc0] sm:$0xff] }
 0x1fb   : > { %v484_v1 = vpop.f32.mrb[3].mxu1  ;;  %v493_v26 = vadd.f32 %v1109_v0, %v413_v24  ;;  %v514_v28 = vmax.f32 %v490_v23, 0.0  ;;  %v1040_v0 = vld [vmem:[%s1742_s1 + $0xc8] sm:$0xff] }
 0x1fc   : > { %v485_v27 = vadd.f32 %v484_v1, %v403_v19  ;;  %v512_v30 = vmax.f32 %v482_v25, 0.0  ;;  %v726_v1 = vpack.c.bf16 %v1040_v0, %v1039_v63 }
 0x1fd   : > { %v515_v32 = vmax.f32 %v493_v26, 0.0  ;;  %v534_v38 = vsub.f32 %v514_v28, %v1553_v50 }
 0x1fe   : > { %v513_v35 = vmax.f32 %v485_v27, 0.0  ;;  %v532_v41 = vsub.f32 %v512_v30, %v1542_v46  ;;  %1130 = vmatprep.mubr.msk.bf16.mxu1 %vm261_vm0, %v726_v1 }
 0x1ff   : > { %v535_v44 = vsub.f32 %v515_v32, %v1548_v48 }
 0x200   : > { %v1112_v4 = vpop.f32.mrb[4].mxu1  ;;  %v533_v51 = vsub.f32 %v513_v35, %v1545_v47 }
 0x201   : > { %v506_v5 = vadd.f32 %v1112_v4, %v428_v2  ;;  %v497_v6 = vpop.f32.mrb[5].mxu1  ;;  %v591_v2 = vpop.permute.xlu0 %590 }
 0x202   : > { %v498_v7 = vadd.f32 %v497_v6, %v418_v60  ;;  %v1113_v11 = vpop.f32.mrb[6].mxu1  ;;  %v1025_v60 = vld [vmem:[%s1742_s1 + $0xb0] sm:$0xff]  ;;  %v596_v4 = vpop.permute.xlu1 %595 }
 0x203   : > { %v518_v14 = vmul.f32 0.5, %v506_v5  ;;  %v509_v15 = vadd.f32 %v1113_v11, %v433_v3  ;;  %v500_v16 = vpop.f32.mrb[7].mxu1 }
 0x204   : > { %v516_v17 = vmul.f32 0.5, %v498_v7  ;;  %v501_v18 = vadd.f32 %v500_v16, %v423_v62  ;;  %v556_v62 = vpack.c.bf16 %v1026_v61, %v1025_v60 }
 0x205   : > { %1206 = vtanh.f32 %v518_v14  ;;  %v519_v20 = vmul.f32 0.5, %v509_v15  ;;  %v601_v11 = vpop.permute.xlu0 %600 }
 0x206   : > { %1208 = vtanh.f32 %v516_v17  ;;  %v517_v21 = vmul.f32 0.5, %v501_v18  ;;  %v606_v13 = vpop.permute.xlu1 %605 }
 0x207   : > { %1210 = vtanh.f32 %v519_v20 }
 0x208   : > { %1212 = vtanh.f32 %v517_v21 }
 0x209   : > { %v571_v19 = vpop.permute.xlu0 %570 }
 0x20a   : > { %v576_v25 = vpop.permute.xlu1 %575 }
 0x20d   : > { %v581_v28 = vpop.permute.xlu0 %580 }
 0x20e   : > { %v586_v30 = vpop.permute.xlu1 %585 }
 0x20f   : > { %v1207_v29 = vpop.eup %1206 }
 0x210   : > { %v1209_v31 = vpop.eup %1208  ;;  %v526_v33 = vmul.f32 0.5, %v1207_v29 }
 0x211   : > { %v1211_v34 = vpop.eup %1210  ;;  %v524_v36 = vmul.f32 0.5, %v1209_v31 }
 0x212   : > { %v1213_v37 = vpop.eup %1212  ;;  %v530_v39 = vadd.f32 0.5, %v526_v33  ;;  %v527_v40 = vmul.f32 0.5, %v1211_v34 }
 0x213   : > { %v528_v42 = vadd.f32 0.5, %v524_v36  ;;  %v525_v43 = vmul.f32 0.5, %v1213_v37 }
 0x214   : > { %v538_v45 = vmul.f32 %v534_v38, %v530_v39  ;;  %v531_v49 = vadd.f32 0.5, %v527_v40 }
 0x215   : > { %v536_v8 = vmul.f32 %v532_v41, %v528_v42  ;;  %v529_v9 = vadd.f32 0.5, %v525_v43 }
 0x216   : > { %v539_v12 = vmul.f32 %v535_v44, %v531_v49  ;;  %v1601_v56 = vadd.f32 %v538_v45, %v1553_v50  ;;  %v1024_v50 = vld [vmem:[%s1742_s1 + $0xa8] sm:$0xff] }
 0x217   : > { %v537_v10 = vmul.f32 %v533_v51, %v529_v9  ;;  %v1590_v52 = vadd.f32 %v536_v8, %v1542_v46  ;;  %v1021_v46 = vld [vmem:[%s1742_s1 + $0x90] sm:$0xff] }
 0x218   : > { %v1596_v54 = vadd.f32 %v539_v12, %v1548_v48  ;;  %v1023_v48 = vld [vmem:[%s1742_s1 + $0xa0] sm:$0xff] }
 0x219   : > { %v1593_v53 = vadd.f32 %v537_v10, %v1545_v47  ;;  %v1022_v47 = vld [vmem:[%s1742_s1 + $0x98] sm:$0xff]  ;;  %v555_v59 = vpack.c.bf16 %v1024_v50, %v1023_v48 }
 0x21a   : > { %v558_v57 = vpack.c.bf16 %v1596_v54, %v1601_v56  ;;  %v554_v58 = vpack.c.bf16 %v1022_v47, %v1021_v46 }
 0x21b   : > { %v557_v55 = vpack.c.bf16 %v1593_v53, %v1590_v52 }
 0x21d   : > { %1114 = vmatprep.subr.bf16.mxu0 %v557_v55 }
 0x21e   : > { %1115 = vmatpush3.bf16.msra.mxu0 %v557_v55 }
 0x21f   : > { %1116 = vmatprep.subr.bf16.mxu0 %v558_v57 }
 0x222   : > { %1117 = vmatpush3.bf16.msra.mxu0 %v558_v57 }
 0x225   : > { %1119 = vmatmul.mubr.msk.bf16.vlgmr.msra.gmra.mrb[8].mxu0 %vm261_vm0, %v554_v58 }
 0x226   : > { %1122 = vmatprep.mubr.msk.bf16.mxu0 %vm261_vm0, %v555_v59 }
 0x22d   : > { %1123 = vmatmul.mubr.msk.bf16.gmra.mrb[12].mxu0 %vm261_vm0, %v556_v62 }
 0x2f8   : > { %v1120_v3 = vpop.f32.mrb[8].mxu0 }
 0x2f9   : > { %v654_v5 = vpop.f32.mrb[9].mxu0  ;;  %v663_v29 = vadd.f32 %v1120_v3, %v581_v28  ;;  %v1046_v3 = vld [vmem:[%s1742_s1 + $0xf8] sm:$0xff] }
 0x2fa   : > { %v1121_v6 = vpop.f32.mrb[10].mxu0  ;;  %v655_v31 = vadd.f32 %v654_v5, %v571_v19  ;;  %v764_v5 = vpop.permute.xlu0 %763 }
 0x2fb   : > { %v657_v7 = vpop.f32.mrb[11].mxu0  ;;  %v666_v32 = vadd.f32 %v1121_v6, %v586_v30  ;;  %v687_v34 = vmax.f32 %v663_v29, 0.0 }
 0x2fc   : > { %v658_v33 = vadd.f32 %v657_v7, %v576_v25  ;;  %v685_v36 = vmax.f32 %v655_v31, 0.0  ;;  %v769_v7 = vpop.permute.xlu1 %768 }
 0x2fd   : > { %v688_v38 = vmax.f32 %v666_v32, 0.0  ;;  %v707_v44 = vsub.f32 %v687_v34, %v1601_v56 }
 0x2fe   : > { %v686_v41 = vmax.f32 %v658_v33, 0.0  ;;  %v705_v51 = vsub.f32 %v685_v36, %v1590_v52 }
 0x2ff   : > { %v708_v12 = vsub.f32 %v688_v38, %v1596_v54 }
 0x300   : > { %v1124_v14 = vpop.f32.mrb[12].mxu0  ;;  %v706_v57 = vsub.f32 %v686_v41, %v1593_v53 }
 0x301   : > { %v679_v15 = vadd.f32 %v1124_v14, %v601_v11  ;;  %v670_v16 = vpop.f32.mrb[13].mxu0 }
 0x302   : > { %v671_v17 = vadd.f32 %v670_v16, %v591_v2  ;;  %v1125_v18 = vpop.f32.mrb[14].mxu0  ;;  %v1045_v2 = vld [vmem:[%s1742_s1 + $0xf0] sm:$0xff]  ;;  %v779_v16 = vpop.permute.xlu1 %778 }
 0x303   : > { %v691_v20 = vmul.f32 0.5, %v679_v15  ;;  %v682_v21 = vadd.f32 %v1125_v18, %v606_v13  ;;  %v673_v22 = vpop.f32.mrb[15].mxu0  ;;  %v774_v15 = vpop.permute.xlu0 %773 }
 0x304   : > { %v689_v23 = vmul.f32 0.5, %v671_v17  ;;  %v674_v24 = vadd.f32 %v673_v22, %v596_v4  ;;  %v729_v4 = vpack.c.bf16 %v1046_v3, %v1045_v2 }
 0x305   : > { %1214 = vtanh.f32 %v691_v20  ;;  %v692_v26 = vmul.f32 0.5, %v682_v21 }
 0x306   : > { %1216 = vtanh.f32 %v689_v23  ;;  %v690_v27 = vmul.f32 0.5, %v674_v24  ;;  %v749_v28 = vpop.permute.xlu1 %748 }
 0x307   : > { %1218 = vtanh.f32 %v692_v26  ;;  %v744_v22 = vpop.permute.xlu0 %743 }
 0x308   : > { %1220 = vtanh.f32 %v690_v27 }
 0x30a   : > { %v759_v33 = vpop.permute.xlu1 %758 }
 0x30b   : > { %v754_v31 = vpop.permute.xlu0 %753 }
 0x30f   : > { %v1215_v35 = vpop.eup %1214 }
 0x310   : > { %v1217_v37 = vpop.eup %1216  ;;  %v699_v39 = vmul.f32 0.5, %v1215_v35 }
 0x311   : > { %v1219_v40 = vpop.eup %1218  ;;  %v697_v42 = vmul.f32 0.5, %v1217_v37 }
 0x312   : > { %v1221_v43 = vpop.eup %1220  ;;  %v703_v45 = vadd.f32 0.5, %v699_v39  ;;  %v700_v49 = vmul.f32 0.5, %v1219_v40 }
 0x313   : > { %v701_v8 = vadd.f32 0.5, %v697_v42  ;;  %v698_v9 = vmul.f32 0.5, %v1221_v43 }
 0x314   : > { %v711_v10 = vmul.f32 %v707_v44, %v703_v45  ;;  %v704_v55 = vadd.f32 0.5, %v700_v49 }
 0x315   : > { %v709_v46 = vmul.f32 %v705_v51, %v701_v8  ;;  %v702_v47 = vadd.f32 0.5, %v698_v9 }
 0x316   : > { %v712_v48 = vmul.f32 %v708_v12, %v704_v55  ;;  %v1649_v62 = vadd.f32 %v711_v10, %v1601_v56  ;;  %v1044_v56 = vld [vmem:[%s1742_s1 + $0xe8] sm:$0xff] }
 0x317   : > { %v710_v50 = vmul.f32 %v706_v57, %v702_v47  ;;  %v1638_v58 = vadd.f32 %v709_v46, %v1590_v52  ;;  %v1041_v52 = vld [vmem:[%s1742_s1 + $0xd0] sm:$0xff] }
 0x318   : > { %v1644_v60 = vadd.f32 %v712_v48, %v1596_v54  ;;  %v1043_v54 = vld [vmem:[%s1742_s1 + $0xe0] sm:$0xff] }
 0x319   : > { %v1641_v59 = vadd.f32 %v710_v50, %v1593_v53  ;;  %v1042_v53 = vld [vmem:[%s1742_s1 + $0xd8] sm:$0xff]  ;;  %v728_v1 = vpack.c.bf16 %v1044_v56, %v1043_v54 }
 0x31a   : > { %v731_v63 = vpack.c.bf16 %v1644_v60, %v1649_v62  ;;  %v727_v0 = vpack.c.bf16 %v1042_v53, %v1041_v52 }
 0x31b   : > { %v730_v61 = vpack.c.bf16 %v1641_v59, %v1638_v58 }
 0x31d   : > { %1126 = vmatprep.subr.bf16.mxu1 %v730_v61 }
 0x31e   : > { %1127 = vmatpush3.bf16.msra.mxu1 %v730_v61 }
 0x31f   : > { %1128 = vmatprep.subr.bf16.mxu1 %v731_v63 }
 0x322   : > { %1129 = vmatpush3.bf16.msra.mxu1 %v731_v63 }
 0x325   : > { %1131 = vmatmul.mubr.msk.bf16.vlgmr.msra.gmra.mrb[8].mxu1 %vm261_vm0, %v727_v0 }
 0x326   : > { %1134 = vmatprep.mubr.msk.bf16.mxu1 %vm261_vm0, %v728_v1 }
 0x32d   : > { %1135 = vmatmul.mubr.msk.bf16.gmra.mrb[12].mxu1 %vm261_vm0, %v729_v4 }
 0x3f8   : > { %v1132_v6 = vpop.f32.mrb[8].mxu1 }
 0x3f9   : > { %v827_v11 = vpop.f32.mrb[9].mxu1  ;;  %v836_v32 = vadd.f32 %v1132_v6, %v754_v31 }
 0x3fa   : > { %v1133_v13 = vpop.f32.mrb[10].mxu1  ;;  %v828_v34 = vadd.f32 %v827_v11, %v744_v22 }
 0x3fb   : > { %v830_v14 = vpop.f32.mrb[11].mxu1  ;;  %v839_v35 = vadd.f32 %v1133_v13, %v759_v33  ;;  %v860_v37 = vmax.f32 %v836_v32, 0.0 }
 0x3fc   : > { %v831_v36 = vadd.f32 %v830_v14, %v749_v28  ;;  %v858_v39 = vmax.f32 %v828_v34, 0.0 }
 0x3fd   : > { %v861_v41 = vmax.f32 %v839_v35, 0.0  ;;  %v880_v51 = vsub.f32 %v860_v37, %v1649_v62 }
 0x3fe   : > { %v859_v44 = vmax.f32 %v831_v36, 0.0  ;;  %v878_v12 = vsub.f32 %v858_v39, %v1638_v58 }
 0x3ff   : > { %v881_v57 = vsub.f32 %v861_v41, %v1644_v60 }
 0x400   : > { %v1136_v17 = vpop.f32.mrb[12].mxu1  ;;  %v879_v48 = vsub.f32 %v859_v44, %v1641_v59 }
 0x401   : > { %v852_v18 = vadd.f32 %v1136_v17, %v774_v15  ;;  %v843_v19 = vpop.f32.mrb[13].mxu1 }
 0x402   : > { %v844_v20 = vadd.f32 %v843_v19, %v764_v5  ;;  %v1137_v21 = vpop.f32.mrb[14].mxu1 }
 0x403   : > { %v864_v23 = vmul.f32 0.5, %v852_v18  ;;  %v855_v24 = vadd.f32 %v1137_v21, %v779_v16  ;;  %v846_v25 = vpop.f32.mrb[15].mxu1 }
 0x404   : > { %v862_v26 = vmul.f32 0.5, %v844_v20  ;;  %v847_v27 = vadd.f32 %v846_v25, %v769_v7 }
 0x405   : > { %1222 = vtanh.f32 %v864_v23  ;;  %v865_v29 = vmul.f32 0.5, %v855_v24 }
 0x406   : > { %1224 = vtanh.f32 %v862_v26  ;;  %v863_v30 = vmul.f32 0.5, %v847_v27 }
 0x407   : > { %1226 = vtanh.f32 %v865_v29 }
 0x408   : > { %1228 = vtanh.f32 %v863_v30 }
 0x40f   : > { %v1223_v38 = vpop.eup %1222 }
 0x410   : > { %v1225_v40 = vpop.eup %1224  ;;  %v872_v42 = vmul.f32 0.5, %v1223_v38 }
 0x411   : > { %v1227_v43 = vpop.eup %1226  ;;  %v870_v45 = vmul.f32 0.5, %v1225_v40 }
 0x412   : > { %v1229_v49 = vpop.eup %1228  ;;  %v876_v8 = vadd.f32 0.5, %v872_v42  ;;  %v873_v9 = vmul.f32 0.5, %v1227_v43 }
 0x413   : > { %v874_v10 = vadd.f32 0.5, %v870_v45  ;;  %v871_v55 = vmul.f32 0.5, %v1229_v49 }
 0x414   : > { %v884_v46 = vmul.f32 %v880_v51, %v876_v8  ;;  %v877_v47 = vadd.f32 0.5, %v873_v9 }
 0x415   : > { %v882_v50 = vmul.f32 %v878_v12, %v874_v10  ;;  %v875_v61 = vadd.f32 0.5, %v871_v55 }
 0x416   : > { %v888_v63 = vadd.f32 %v884_v46, %v1649_v62  ;;  %v885_v52 = vmul.f32 %v881_v57, %v877_v47 }
 0x417   : > { %v886_v53 = vadd.f32 %v882_v50, %v1638_v58  ;;  %v883_v54 = vmul.f32 %v879_v48, %v875_v61 }
 0x418   : > { %892 = vst [vmem:[%s185_s26 + $0x10] sm:$0xff] %v888_v63  ;;  %v889_v56 = vadd.f32 %v885_v52, %v1644_v60 }
 0x419   : > { %890 = vst [vmem:[%s185_s26] sm:$0xff] %v886_v53  ;;  %v887_v62 = vadd.f32 %v883_v54, %v1641_v59 }
 0x41a   : > { %893 = vst [vmem:[%s185_s26 + $0x18] sm:$0xff] %v889_v56 }
 0x41b   : > { %891 = vst [vmem:[%s185_s26 + $0x8] sm:$0xff] %v887_v62 }
 0x41c   : > { %1243 = shalt.err (!%p1240_p5)
}
 0x41d   : > { %s1244_s8 = scalar_lea.hbm %s1688_s30, 512  ;;  %s1248_s11 = scalar_lea.hbm %s1744_s3, 1024 }
 0x41e   : > { %p1245_p6 = scmp.ne.s32.totalorder %s1688_s30, %s1244_s8  ;;  %p1249_p10 = scmp.lt.u32.totalorder %s1688_s30, %s1744_s3 }
 0x41f   : > { %p1250_p11 = scmp.lt.u32.totalorder %s1248_s11, %s1244_s8  ;;  %p1252_p13 = scmp.lt.u32.totalorder %s1244_s8, %s1688_s30 }
 0x420   : > { %p1246_p7 = pnand %p1245_p6, %p1374_p4 }
 0x421   : > { %p1251_p12 = por %p1250_p11, %p1249_p10 }
 0x422   : > { %p1247_p9 = pneg %p1246_p7 }
 0x423   : > { %p1253_p0 = por %p1252_p13, %p1251_p12 }
 0x425   : > { %p1254_p1 = pnand %p1253_p0, %p1247_p9 }
 0x427   : > { %1257 = shalt.err (!%p1254_p1)
}
 0x428   : > { %s1312_s21 = smov 128   ;;  %s1313_s23 = smov 8  }
 0x429   : > { %1138 = dma.vmem_to_hbm [thread:$0]  (%p1374_p4), %s1690_s27, 512, %s1688_s30, %s1695_s15, %s1312_s21, %s1312_s21, %s1313_s23  }
 0x42a PF: > { %p1144_p2 = scmp.ge.s32.totalorder %s1308_s17, 2  ;;  %s924_s26 = sand.u32 1, %s1288_s12  }
 0x42b   : > { %s925_s28 = scalar_lea.sflag [#allocation3], %s924_s26 }
 0x42c   : > { %p1141_p3 = pnand %p1144_p2, %p1381_p8 }
 0x42e   : > { %1283 = dma.done.wait (!%p1141_p3), %s925_s28, 512  }
 0x42f   : > { %1285 = vsyncadd (!%p1141_p3), %s925_s28, 4294966784  ;;  %s16_s17 = sadd.s32 1, %s1308_s17   ;;  %s1747_s12 = smov %s1292_s13 }
 0x430   : > { %p13_p5 = scmp.ge.s32.totalorder %s16_s17, 4   ;;  %s1748_s13 = smov %s1296_s14 }
 0x431   : > { %s1749_s14 = smov %s1387_s25  ;;  %s1750_s15 = smov %s1304_s16 }
 0x432   : > { %s1751_s16 = smov %s1753_s20  ;;  %15 = sbr.rel (!%p13_p5) target bundleno = 4 (0x4), region = 73 }
 0x439   :  { %930 = vsyncpa [#allocation3], 1 }
 0x43a   :  { %932 = vsyncpa [#allocation3 + $0x1], 1 }

</bundles_post_ra>
